<compile_context>
chip_gen: v5e
topology: v5e:2x2
jax: 0.10.0
libtpu: 0.0.40
codegen_flags: <defaults>
</compile_context>

<pallas_src>
import jax
import jax.numpy as jnp
from jax.experimental import pallas as pl
from jax.experimental.pallas import tpu as pltpu


def _cheb_kernel_xtheta_first(at_ref, x_ref, theta_ref, o_ref, tmp_ref):
    # Reassociated order: tmp = X @ Theta (computed once), then A_tile @ tmp.
    # at_ref    : (tm, B)       row-tile of spatial_attention (rows may be zero-padded)
    # x_ref     : (B, F_in)     full graph signal (resident)
    # theta_ref : (F_in, F_out) resident
    # tmp_ref   : (B, F_out)    VMEM scratch, persists across grid steps
    @pl.when(pl.program_id(0) == 0)
    def _():
        tmp_ref[...] = jnp.dot(
            x_ref[...], theta_ref[...], preferred_element_type=jnp.float32
        )

    out = jnp.dot(at_ref[...], tmp_ref[...], preferred_element_type=jnp.float32)
    o_ref[...] = jnp.maximum(out, 0.0).astype(o_ref.dtype)


def _cheb_kernel_ax_first(at_ref, x_ref, theta_ref, o_ref):
    # Original order (used when F_out > F_in, where it is the cheaper association).
    rhs = jnp.dot(at_ref[...], x_ref[...], preferred_element_type=jnp.float32)
    out = jnp.dot(rhs, theta_ref[...], preferred_element_type=jnp.float32)
    o_ref[...] = jnp.maximum(out, 0.0).astype(o_ref.dtype)


def cheb_conv_with_sat(x, spatial_attention, theta, *, tm=None):
    """Fused relu(spatial_attention @ x @ theta), association order chosen by shape."""
    B, F_in = x.shape
    F_out = theta.shape[1]
    assert spatial_attention.shape == (B, B)
    assert theta.shape[0] == F_in

    # A @ (X @ Theta) is cheaper (or equal) when F_out <= F_in.
    reassociate = F_out <= F_in

    # Single grid step for small problems; MXU-native row tile for large B.
    if tm is None:
        tm = B if B <= 256 else 128
    n_tiles = pl.cdiv(B, tm)
    B_rows = n_tiles * tm

    a = spatial_attention
    if B_rows != B:
        # Pad the row axis of A (and hence the output) instead of asserting divisibility.
        a = jnp.pad(a, ((0, B_rows - B), (0, 0)))

    if reassociate:
        flops = 2 * B * F_in * F_out + 2 * B_rows * B * F_out
    else:
        flops = 2 * B_rows * B * F_in + 2 * B_rows * F_in * F_out
    bytes_accessed = 4 * (B_rows * B + B * F_in + F_in * F_out + B_rows * F_out)
    cost = pl.CostEstimate(
        flops=flops, transcendentals=0, bytes_accessed=bytes_accessed
    )

    in_specs = [
        # row tile of (padded) spatial attention; last dim = full array dim B
        pl.BlockSpec((tm, B), lambda i: (i, 0)),
        # full graph signal, resident across all grid steps
        pl.BlockSpec((B, F_in), lambda i: (0, 0)),
        # full Theta, resident across all grid steps
        pl.BlockSpec((F_in, F_out), lambda i: (0, 0)),
    ]
    out_spec = pl.BlockSpec((tm, F_out), lambda i: (i, 0))

    if reassociate:
        kernel = _cheb_kernel_xtheta_first
        scratch = [pltpu.VMEM((B, F_out), jnp.float32)]
        # Scratch is written at step 0 and reused -> keep the grid sequential.
        semantics = ("arbitrary",)
    else:
        kernel = _cheb_kernel_ax_first
        scratch = []
        semantics = ("parallel",)

    out = pl.pallas_call(
        kernel,
        out_shape=jax.ShapeDtypeStruct((B_rows, F_out), x.dtype),
        grid_spec=pltpu.PrefetchScalarGridSpec(
            num_scalar_prefetch=0,
            grid=(n_tiles,),
            in_specs=in_specs,
            out_specs=out_spec,
            scratch_shapes=scratch,
        ),
        compiler_params=pltpu.CompilerParams(dimension_semantics=semantics),
        cost_estimate=cost,
    )(a, x, theta)

    if B_rows != B:
        out = out[:B]
    return out


if __name__ == "__main__":
    key = jax.random.PRNGKey(0)

    def run_case(case_key, B, F_in, F_out):
        kx, ka, kt = jax.random.split(case_key, 3)
        x = jax.random.normal(kx, (B, F_in), dtype=jnp.float32)
        spatial_attention = jax.random.normal(ka, (B, B), dtype=jnp.float32)
        # Deterministic parameter init (PyTorch module never initializes Theta).
        theta = jax.random.normal(kt, (F_in, F_out), dtype=jnp.float32) * 0.02

        out = jax.block_until_ready(cheb_conv_with_sat(x, spatial_attention, theta))

        # Pure-JAX reference (PyTorch association order).
        ref = jax.nn.relu((spatial_attention @ x) @ theta)
        assert out.shape == (B, F_out)
        assert jnp.allclose(out, ref, atol=2e-3, rtol=2e-3), f"mismatch B={B}"

    k1, k2, k3 = jax.random.split(key, 3)
    # Docstring shape (x: [64, 512]): single grid step, reassociated A @ (X @ Theta).
    run_case(k1, 64, 512, 128)
    # Larger, non-divisible B: row-tiled tm=128 with padded tail, shared X@Theta scratch.
    run_case(k2, 272, 512, 128)
    # F_out > F_in: falls back to the (A @ X) @ Theta order.
    run_case(k3, 64, 128, 512)

    print("KERNEL_OK")
</pallas_src>

<mosaic_0001>
module attributes {stable_mosaic.version = 11 : i64} {
  func.func @_cheb_kernel_xtheta_first(%arg0: i32, %arg1: memref<64x64xf32, #tpu.memory_space<vmem>>, %arg2: memref<64x512xf32, #tpu.memory_space<vmem>>, %arg3: memref<512x128xf32, #tpu.memory_space<vmem>>, %arg4: memref<64x128xf32, #tpu.memory_space<vmem>>, %arg5: memref<64x128xf32, #tpu.memory_space<vmem>>) attributes {dimension_semantics = [#tpu.dimension_semantics<arbitrary>], iteration_bounds = array<i64: 1>, scalar_prefetch = 0 : i64, scratch_operands = 1 : i64, tpu.core_type = #tpu.core_type<tc>, window_params = [{transform_indices = @transform_0, window_bounds = array<i64: 64, 64>}, {pipeline_mode = #tpu.pipeline_mode<synchronous>, transform_indices = @transform_1, window_bounds = array<i64: 64, 512>}, {pipeline_mode = #tpu.pipeline_mode<synchronous>, transform_indices = @transform_2, window_bounds = array<i64: 512, 128>}, {transform_indices = @transform_3, window_bounds = array<i64: 64, 128>}]} {
    %c0_i32 = arith.constant 0 : i32
    %0 = arith.cmpi eq, %arg0, %c0_i32 : i32
    %1 = arith.extui %0 : i1 to i32
    %c0_i32_0 = arith.constant 0 : i32
    %2 = arith.cmpi ne, %1, %c0_i32_0 : i32
    scf.if %2 {
      %c0_7 = arith.constant 0 : index
      %c0_8 = arith.constant 0 : index
      %9 = vector.load %arg2[%c0_7, %c0_8] : memref<64x512xf32, #tpu.memory_space<vmem>>, vector<64x512xf32>
      %c0_9 = arith.constant 0 : index
      %c0_10 = arith.constant 0 : index
      %10 = vector.load %arg3[%c0_9, %c0_10] : memref<512x128xf32, #tpu.memory_space<vmem>>, vector<512x128xf32>
      %cst_11 = arith.constant dense<0.000000e+00> : vector<64x128xf32>
      %11 = tpu.matmul %9, %10, %cst_11 {dimension_numbers = #tpu.dot_dimension_numbers<[1], [0], [0], [1], [0, 0, 1, 1], [], []>} : vector<64x512xf32>, vector<512x128xf32>, vector<64x128xf32> -> vector<64x128xf32>
      %c0_12 = arith.constant 0 : index
      %c0_13 = arith.constant 0 : index
      %12 = vector.load %arg5[%c0_12, %c0_13] : memref<64x128xf32, #tpu.memory_space<vmem>>, vector<64x128xf32>
      tpu.vector_store %arg5[%c0_12, %c0_13], %11 {strides = array<i32>} : memref<64x128xf32, #tpu.memory_space<vmem>>, vector<64x128xf32>,
    } else {
    }
    %c0 = arith.constant 0 : index
    %c0_1 = arith.constant 0 : index
    %3 = vector.load %arg1[%c0, %c0_1] : memref<64x64xf32, #tpu.memory_space<vmem>>, vector<64x64xf32>
    %c0_2 = arith.constant 0 : index
    %c0_3 = arith.constant 0 : index
    %4 = vector.load %arg5[%c0_2, %c0_3] : memref<64x128xf32, #tpu.memory_space<vmem>>, vector<64x128xf32>
    %cst = arith.constant dense<0.000000e+00> : vector<64x128xf32>
    %5 = tpu.matmul %3, %4, %cst {dimension_numbers = #tpu.dot_dimension_numbers<[1], [0], [0], [1], [0, 0, 1, 1], [], []>} : vector<64x64xf32>, vector<64x128xf32>, vector<64x128xf32> -> vector<64x128xf32>
    %cst_4 = arith.constant 0.000000e+00 : f32
    %6 = vector.broadcast %cst_4 : f32 to vector<64x128xf32>
    %7 = arith.maximumf %5, %6 : vector<64x128xf32>
    %c0_5 = arith.constant 0 : index
    %c0_6 = arith.constant 0 : index
    %8 = vector.load %arg4[%c0_5, %c0_6] : memref<64x128xf32, #tpu.memory_space<vmem>>, vector<64x128xf32>
    tpu.vector_store %arg4[%c0_5, %c0_6], %7 {strides = array<i32>} : memref<64x128xf32, #tpu.memory_space<vmem>>, vector<64x128xf32>,
    return
  }
  func.func @transform_0(%arg0: i32) -> (i32, i32) {
    %c0_i32 = arith.constant 0 : i32
    %c0_i32_0 = arith.constant 0 : i32
    return %arg0, %c0_i32 : i32, i32
  }
  func.func @transform_1(%arg0: i32) -> (i32, i32) {
    %c0_i32 = arith.constant 0 : i32
    %c0_i32_0 = arith.constant 0 : i32
    %c0_i32_1 = arith.constant 0 : i32
    return %c0_i32, %c0_i32_0 : i32, i32
  }
  func.func @transform_2(%arg0: i32) -> (i32, i32) {
    %c0_i32 = arith.constant 0 : i32
    %c0_i32_0 = arith.constant 0 : i32
    %c0_i32_1 = arith.constant 0 : i32
    return %c0_i32, %c0_i32_0 : i32, i32
  }
  func.func @transform_3(%arg0: i32) -> (i32, i32) {
    %c0_i32 = arith.constant 0 : i32
    %c0_i32_0 = arith.constant 0 : i32
    return %arg0, %c0_i32 : i32, i32
  }
}

</mosaic_0001>

<bundles_post_ra>
// kernel: tpu_custom_call.1
= control target key start
LH: loop header
LB: loop body
LE: loop exit
PB: predicated region body
PF: predicated region fallthrough
CT: control target
= control target key end

     0   :  { %8 = vsyncpa [#allocation4], 0  ;;  %s659_s0 = inlined_call_operand.hbm [shape: f32[64,64], index: 0, kind: input, shape index: {}]   ;;  %s660_s1 = inlined_call_operand.hbm [shape: f32[64,512], index: 1, kind: input, shape index: {}]   ;;  %s661_s2 = inlined_call_operand.hbm [shape: f32[512,128], index: 2, kind: input, shape index: {}]   ;;  %s662_s3 = inlined_call_operand.hbm [shape: f32[64,128], index: 3, kind: output, shape index: {}]  }
   0x1   :  { %9 = vsyncpa [#allocation7], 0  ;;  %s28_s14 = sshll.u32 %s660_s1, 4  ;;  %s29_s14 = int_to_ptr.hbm [resolvable:$true] %s28_s14 }
   0x2   :  { %10 = vsyncpa [#allocation5], 0  ;;  %s602_s15 = smov [#allocation6]   ;;  %s15_s19 = sshll.u32 %s659_s0, 4  ;;  %s16_s19 = int_to_ptr.hbm [resolvable:$true] %s15_s19 }
   0x3   :  { %s30_s16 = sshll.u32 %s602_s15, 4  ;;  %s603_s20 = smov 512   ;;  %s31_s16 = int_to_ptr.vmem [resolvable:$true] %s30_s16 }
   0x4   :  { %s604_s21 = smov 32   ;;  %s605_s22 = smov [#allocation3]  }
   0x5   :  { %36 = dma.hbm_to_vmem [thread:$0]  %s29_s14, 4096, %s31_s16, [#allocation7], %s603_s20, %s603_s20, %s604_s21  }
   0x6   :  { %s17_s23 = sshll.u32 %s605_s22, 4  ;;  %s606_s24 = smov 128   ;;  %s18_s23 = int_to_ptr.vmem [resolvable:$true] %s17_s23 }
   0x7   :  { %s607_s25 = smov 8   ;;  %s41_s27 = sshll.u32 %s661_s2, 4  ;;  %s42_s27 = int_to_ptr.hbm [resolvable:$true] %s41_s27 }
   0x8   :  { %23 = dma.hbm_to_vmem [thread:$0]  %s16_s19, 1024, %s18_s23, [#allocation4], %s606_s24, %s606_s24, %s607_s25  }
   0x9   :  { %s608_s28 = smov [#allocation8]  }
   0xa   :  { %s43_s0 = sshll.u32 %s608_s28, 4  ;;  %s44_s0 = int_to_ptr.vmem [resolvable:$true] %s43_s0 }
   0xb   :  { %49 = dma.hbm_to_vmem [thread:$0]  %s42_s27, 8192, %s44_s0, [#allocation7], %s606_s24, %s606_s24, %s607_s25  }
   0xc   :  { %596 = dma.done.wait [#allocation4], 1024  }
   0xd   :  { %597 = vsyncadd [#allocation4], 4294966272 }
   0xe   :  { %598 = dma.done.wait [#allocation7], 12288  }
   0xf   :  { %599 = vsyncadd [#allocation7], 4294955008  ;;  %v113_v0 = vld [vmem:[#allocation8 + $0x78] sm:$0xff]  ;;  %v112_v1 = vld [vmem:[#allocation8 + $0x70] sm:$0xff]  ;;  %vm350_vm0 = vcmask 523264   ;;  %s609_s2 = smov [#allocation9]  }
  0x10   :  { %460 = vmatpush.msra.mxu1 %v113_v0  ;;  %461 = vmatpush.msra.mxu2 %v113_v0  ;;  %v111_v2 = vld [vmem:[#allocation8 + $0x68] sm:$0xff]  ;;  %v110_v3 = vld [vmem:[#allocation8 + $0x60] sm:$0xff]  ;;  %v109_v4 = vld [vmem:[#allocation8 + $0x58] sm:$0xff]  ;;  %s436_s29 = sshll.u32 %s609_s2, 4  ;;  %s438_s5 = sshll.u32 %s662_s3, 4  ;;  %s437_s29 = int_to_ptr.vmem [resolvable:$true] %s436_s29  ;;  %s439_s5 = int_to_ptr.hbm [resolvable:$true] %s438_s5 }
  0x11   :  { %162 = vmatpush.msra.mxu0 %v113_v0  ;;  %v161_v5 = vld [vmem:[#allocation8 + $0x1f8] sm:$0xff]  ;;  %v160_v6 = vld [vmem:[#allocation8 + $0x1f0] sm:$0xff]  ;;  %v159_v8 = vld [vmem:[#allocation8 + $0x1e8] sm:$0xff] }
  0x12   :  { %462 = vmatpush.msra.mxu1 %v112_v1  ;;  %463 = vmatpush.msra.mxu2 %v112_v1  ;;  %v108_v7 = vld [vmem:[#allocation8 + $0x50] sm:$0xff]  ;;  %v107_v9 = vld [vmem:[#allocation8 + $0x48] sm:$0xff]  ;;  %v158_v10 = vld [vmem:[#allocation8 + $0x1e0] sm:$0xff] }
  0x13   :  { %163 = vmatpush.msra.mxu0 %v112_v1  ;;  %285 = vmatpush.msra.mxu3 %v161_v5  ;;  %v106_v11 = vld [vmem:[#allocation8 + $0x40] sm:$0xff]  ;;  %v157_v12 = vld [vmem:[#allocation8 + $0x1d8] sm:$0xff]  ;;  %v156_v14 = vld [vmem:[#allocation8 + $0x1d0] sm:$0xff] }
  0x14   :  { %464 = vmatpush.msra.mxu1 %v111_v2  ;;  %465 = vmatpush.msra.mxu2 %v111_v2  ;;  %v105_v13 = vld [vmem:[#allocation8 + $0x38] sm:$0xff]  ;;  %v104_v15 = vld [vmem:[#allocation8 + $0x30] sm:$0xff]  ;;  %v155_v16 = vld [vmem:[#allocation8 + $0x1c8] sm:$0xff] }
  0x15   :  { %164 = vmatpush.msra.mxu0 %v111_v2  ;;  %286 = vmatpush.msra.mxu3 %v160_v6  ;;  %v103_v17 = vld [vmem:[#allocation8 + $0x28] sm:$0xff]  ;;  %v154_v18 = vld [vmem:[#allocation8 + $0x1c0] sm:$0xff]  ;;  %v153_v20 = vld [vmem:[#allocation8 + $0x1b8] sm:$0xff] }
  0x16   :  { %466 = vmatpush.msra.mxu1 %v110_v3  ;;  %467 = vmatpush.msra.mxu2 %v110_v3  ;;  %v102_v19 = vld [vmem:[#allocation8 + $0x20] sm:$0xff]  ;;  %v101_v21 = vld [vmem:[#allocation8 + $0x18] sm:$0xff]  ;;  %v152_v22 = vld [vmem:[#allocation8 + $0x1b0] sm:$0xff] }
  0x17   :  { %165 = vmatpush.msra.mxu0 %v110_v3  ;;  %287 = vmatpush.msra.mxu3 %v159_v8  ;;  %v100_v23 = vld [vmem:[#allocation8 + $0x10] sm:$0xff]  ;;  %v151_v24 = vld [vmem:[#allocation8 + $0x1a8] sm:$0xff]  ;;  %v150_v26 = vld [vmem:[#allocation8 + $0x1a0] sm:$0xff] }
  0x18   :  { %468 = vmatpush.msra.mxu1 %v109_v4  ;;  %469 = vmatpush.msra.mxu2 %v109_v4  ;;  %v99_v25 = vld [vmem:[#allocation8 + $0x8] sm:$0xff]  ;;  %v98_v27 = vld [vmem:[#allocation8] sm:$0xff]  ;;  %v145_v29 = vld [vmem:[#allocation8 + $0x178] sm:$0xff] }
  0x19   :  { %166 = vmatpush.msra.mxu0 %v109_v4  ;;  %288 = vmatpush.msra.mxu3 %v158_v10  ;;  %v74_v28 = vld [vmem:[#allocation6 + $0x40] sm:$0xff]  ;;  %v129_v30 = vld [vmem:[#allocation8 + $0xf8] sm:$0xff]  ;;  %v144_v32 = vld [vmem:[#allocation8 + $0x170] sm:$0xff] }
  0x1a   :  { %470 = vmatpush.msra.mxu1 %v108_v7  ;;  %471 = vmatpush.msra.mxu2 %v108_v7  ;;  %v90_v31 = vld [vmem:[#allocation6 + $0xc0] sm:$0xff]  ;;  %v149_v33 = vld [vmem:[#allocation8 + $0x198] sm:$0xff]  ;;  %v128_v34 = vld [vmem:[#allocation8 + $0xf0] sm:$0xff] }
  0x1b   :  { %167 = vmatpush.msra.mxu0 %v108_v7  ;;  %289 = vmatpush.msra.mxu3 %v157_v12  ;;  %v143_v35 = vld [vmem:[#allocation8 + $0x168] sm:$0xff]  ;;  %v148_v36 = vld [vmem:[#allocation8 + $0x190] sm:$0xff]  ;;  %v66_v38 = vld [vmem:[#allocation6] sm:$0xff] }
  0x1c   :  { %472 = vmatpush.msra.mxu1 %v107_v9  ;;  %473 = vmatpush.msra.mxu2 %v107_v9  ;;  %v127_v37 = vld [vmem:[#allocation8 + $0xe8] sm:$0xff]  ;;  %v142_v39 = vld [vmem:[#allocation8 + $0x160] sm:$0xff]  ;;  %v141_v43 = vld [vmem:[#allocation8 + $0x158] sm:$0xff] }
  0x1d   :  { %168 = vmatpush.msra.mxu0 %v107_v9  ;;  %290 = vmatpush.msra.mxu3 %v156_v14  ;;  %v147_v40 = vld [vmem:[#allocation8 + $0x188] sm:$0xff]  ;;  %v126_v41 = vld [vmem:[#allocation8 + $0xe0] sm:$0xff]  ;;  %v125_v44 = vld [vmem:[#allocation8 + $0xd8] sm:$0xff] }
  0x1e   :  { %474 = vmatpush.msra.mxu1 %v106_v11  ;;  %475 = vmatpush.msra.mxu2 %v106_v11  ;;  %v78_v42 = vld [vmem:[#allocation6 + $0x60] sm:$0xff]  ;;  %v140_v46 = vld [vmem:[#allocation8 + $0x150] sm:$0xff]  ;;  %v69_v49 = vld [vmem:[#allocation6 + $0x18] sm:$0xff] }
  0x1f   :  { %169 = vmatpush.msra.mxu0 %v106_v11  ;;  %291 = vmatpush.msra.mxu3 %v155_v16  ;;  %v94_v45 = vld [vmem:[#allocation6 + $0xe0] sm:$0xff]  ;;  %v124_v48 = vld [vmem:[#allocation8 + $0xd0] sm:$0xff]  ;;  %v139_v50 = vld [vmem:[#allocation8 + $0x148] sm:$0xff] }
  0x20   :  { %476 = vmatpush.msra.mxu1 %v105_v13  ;;  %477 = vmatpush.msra.mxu2 %v105_v13  ;;  %v146_v47 = vld [vmem:[#allocation8 + $0x180] sm:$0xff]  ;;  %v123_v51 = vld [vmem:[#allocation8 + $0xc8] sm:$0xff]  ;;  %v137_v56 = vld [vmem:[#allocation8 + $0x138] sm:$0xff] }
  0x21   :  { %170 = vmatpush.msra.mxu0 %v105_v13  ;;  %292 = vmatpush.msra.mxu3 %v154_v18  ;;  %v70_v52 = vld [vmem:[#allocation6 + $0x20] sm:$0xff]  ;;  %v121_v57 = vld [vmem:[#allocation8 + $0xb8] sm:$0xff]  ;;  %v136_v58 = vld [vmem:[#allocation8 + $0x130] sm:$0xff] }
  0x22   :  { %478 = vmatpush.msra.mxu1 %v104_v15  ;;  %479 = vmatpush.msra.mxu2 %v104_v15  ;;  %v138_v53 = vld [vmem:[#allocation8 + $0x140] sm:$0xff]  ;;  %v120_v59 = vld [vmem:[#allocation8 + $0xb0] sm:$0xff]  ;;  %v73_v60 = vld [vmem:[#allocation6 + $0x38] sm:$0xff] }
  0x23   :  { %171 = vmatpush.msra.mxu0 %v104_v15  ;;  %293 = vmatpush.msra.mxu3 %v153_v20  ;;  %v122_v54 = vld [vmem:[#allocation8 + $0xc0] sm:$0xff]  ;;  %v135_v61 = vld [vmem:[#allocation8 + $0x128] sm:$0xff]  ;;  %v133_v2 = vld [vmem:[#allocation8 + $0x118] sm:$0xff] }
  0x24   :  { %480 = vmatpush.msra.mxu1 %v103_v17  ;;  %481 = vmatpush.msra.mxu2 %v103_v17  ;;  %v82_v55 = vld [vmem:[#allocation6 + $0x80] sm:$0xff]  ;;  %v119_v62 = vld [vmem:[#allocation8 + $0xa8] sm:$0xff]  ;;  %v117_v3 = vld [vmem:[#allocation8 + $0x98] sm:$0xff] }
  0x25   :  { %172 = vmatpush.msra.mxu0 %v103_v17  ;;  %294 = vmatpush.msra.mxu3 %v152_v22  ;;  %v134_v63 = vld [vmem:[#allocation8 + $0x120] sm:$0xff]  ;;  %v132_v4 = vld [vmem:[#allocation8 + $0x110] sm:$0xff]  ;;  %v77_v6 = vld [vmem:[#allocation6 + $0x58] sm:$0xff] }
  0x26   :  { %482 = vmatpush.msra.mxu1 %v102_v19  ;;  %483 = vmatpush.msra.mxu2 %v102_v19  ;;  %v118_v0 = vld [vmem:[#allocation8 + $0xa0] sm:$0xff]  ;;  %v116_v5 = vld [vmem:[#allocation8 + $0x90] sm:$0xff]  ;;  %v131_v7 = vld [vmem:[#allocation8 + $0x108] sm:$0xff] }
  0x27   :  { %173 = vmatpush.msra.mxu0 %v102_v19  ;;  %295 = vmatpush.msra.mxu3 %v151_v24  ;;  %v86_v1 = vld [vmem:[#allocation6 + $0xa0] sm:$0xff]  ;;  %v115_v8 = vld [vmem:[#allocation8 + $0x88] sm:$0xff]  ;;  %v68_v11 = vld [vmem:[#allocation6 + $0x10] sm:$0xff] }
  0x28   :  { %484 = vmatpush.msra.mxu1 %v101_v21  ;;  %485 = vmatpush.msra.mxu2 %v101_v21  ;;  %v130_v9 = vld [vmem:[#allocation8 + $0x100] sm:$0xff]  ;;  %v67_v12 = vld [vmem:[#allocation6 + $0x8] sm:$0xff]  ;;  %v81_v13 = vld [vmem:[#allocation6 + $0x78] sm:$0xff] }
  0x29   :  { %174 = vmatpush.msra.mxu0 %v101_v21  ;;  %296 = vmatpush.msra.mxu3 %v150_v26  ;;  %v114_v10 = vld [vmem:[#allocation8 + $0x80] sm:$0xff]  ;;  %v72_v14 = vld [vmem:[#allocation6 + $0x30] sm:$0xff]  ;;  %v71_v15 = vld [vmem:[#allocation6 + $0x28] sm:$0xff] }
  0x2a   :  { %486 = vmatpush.msra.mxu1 %v100_v23  ;;  %487 = vmatpush.msra.mxu2 %v100_v23  ;;  %v85_v16 = vld [vmem:[#allocation6 + $0x98] sm:$0xff]  ;;  %v76_v17 = vld [vmem:[#allocation6 + $0x50] sm:$0xff]  ;;  %v75_v18 = vld [vmem:[#allocation6 + $0x48] sm:$0xff] }
  0x2b   :  { %175 = vmatpush.msra.mxu0 %v100_v23  ;;  %297 = vmatpush.msra.mxu3 %v149_v33  ;;  %v89_v19 = vld [vmem:[#allocation6 + $0xb8] sm:$0xff]  ;;  %v80_v20 = vld [vmem:[#allocation6 + $0x70] sm:$0xff]  ;;  %v79_v21 = vld [vmem:[#allocation6 + $0x68] sm:$0xff] }
  0x2c   :  { %488 = vmatpush.msra.mxu1 %v99_v25  ;;  %489 = vmatpush.msra.mxu2 %v99_v25  ;;  %v93_v22 = vld [vmem:[#allocation6 + $0xd8] sm:$0xff]  ;;  %v84_v23 = vld [vmem:[#allocation6 + $0x90] sm:$0xff]  ;;  %v83_v24 = vld [vmem:[#allocation6 + $0x88] sm:$0xff] }
  0x2d   :  { %176 = vmatpush.msra.mxu0 %v99_v25  ;;  %298 = vmatpush.msra.mxu3 %v148_v36  ;;  %v97_v25 = vld [vmem:[#allocation6 + $0xf8] sm:$0xff]  ;;  %v88_v26 = vld [vmem:[#allocation6 + $0xb0] sm:$0xff] }
  0x2e   :  { %490 = vmatpush.msra.mxu1 %v98_v27  ;;  %491 = vmatpush.msra.mxu2 %v98_v27 }
  0x2f   :  { %184 = vmatmul.f32.vlgmr.msra.gmra.mxu1 %v74_v28  ;;  %196 = vmatmul.f32.vlgmr.msra.gmra.mxu2 %v90_v31  ;;  %v92_v28 = vld [vmem:[#allocation6 + $0xd0] sm:$0xff]  ;;  %v95_v31 = vld [vmem:[#allocation6 + $0xe8] sm:$0xff] }
  0x30   :  { %244 = vmatpush.msrb.mxu2 %v145_v29  ;;  %203 = vmatpush.msrb.mxu1 %v129_v30  ;;  %v91_v29 = vld [vmem:[#allocation6 + $0xc8] sm:$0xff]  ;;  %v96_v30 = vld [vmem:[#allocation6 + $0xf0] sm:$0xff] }
  0x31   :  { %177 = vmatpush.msra.mxu0 %v98_v27  ;;  %299 = vmatpush.msra.mxu3 %v147_v40  ;;  %v87_v27 = vld [vmem:[#allocation6 + $0xa8] sm:$0xff] }
  0x32   :  { %245 = vmatpush.msrb.mxu2 %v144_v32  ;;  %204 = vmatpush.msrb.mxu1 %v128_v34 }
  0x33   :  { %178 = vmatmul.f32.vlgmr.msra.gmra.mxu0 %v66_v38  ;;  %300 = vmatpush.msra.mxu3 %v146_v47 }
  0x34   :  { %246 = vmatpush.msrb.mxu2 %v143_v35  ;;  %205 = vmatpush.msrb.mxu1 %v127_v37 }
  0x35   :  { %301 = vmatmul.f32.vlgmr.msra.gmra.mxu3 %v69_v49 }
  0x36   :  { %247 = vmatpush.msrb.mxu2 %v142_v39  ;;  %206 = vmatpush.msrb.mxu1 %v126_v41 }
  0x37   :  { %187 = vmatmul.f32.gmra.mxu1 %v78_v42  ;;  %199 = vmatmul.f32.gmra.mxu2 %v94_v45 }
  0x38   :  { %248 = vmatpush.msrb.mxu2 %v141_v43  ;;  %207 = vmatpush.msrb.mxu1 %v125_v44 }
  0x3a   :  { %249 = vmatpush.msrb.mxu2 %v140_v46  ;;  %208 = vmatpush.msrb.mxu1 %v124_v48 }
  0x3b   :  { %181 = vmatmul.f32.gmra.mxu0 %v70_v52 }
  0x3c   :  { %250 = vmatpush.msrb.mxu2 %v139_v50  ;;  %209 = vmatpush.msrb.mxu1 %v123_v51 }
  0x3d   :  { %304 = vmatmul.f32.gmra.mxu3 %v73_v60 }
  0x3e   :  { %251 = vmatpush.msrb.mxu2 %v138_v53  ;;  %210 = vmatpush.msrb.mxu1 %v122_v54 }
  0x3f   :  { %190 = vmatmul.f32.gmra.mxu1 %v82_v55 }
  0x40   :  { %252 = vmatpush.msrb.mxu2 %v137_v56  ;;  %211 = vmatpush.msrb.mxu1 %v121_v57 }
  0x42   :  { %253 = vmatpush.msrb.mxu2 %v136_v58  ;;  %212 = vmatpush.msrb.mxu1 %v120_v59 }
  0x44   :  { %254 = vmatpush.msrb.mxu2 %v135_v61  ;;  %213 = vmatpush.msrb.mxu1 %v119_v62 }
  0x45   :  { %307 = vmatmul.f32.gmra.mxu3 %v77_v6 }
  0x46   :  { %255 = vmatpush.msrb.mxu2 %v134_v63  ;;  %214 = vmatpush.msrb.mxu1 %v118_v0 }
  0x47   :  { %193 = vmatmul.f32.gmra.mxu1 %v86_v1 }
  0x48   :  { %256 = vmatpush.msrb.mxu2 %v133_v2  ;;  %215 = vmatpush.msrb.mxu1 %v117_v3 }
  0x4a   :  { %257 = vmatpush.msrb.mxu2 %v132_v4  ;;  %216 = vmatpush.msrb.mxu1 %v116_v5 }
  0x4c   :  { %258 = vmatpush.msrb.mxu2 %v131_v7  ;;  %217 = vmatpush.msrb.mxu1 %v115_v8 }
  0x4d   :  { %310 = vmatmul.f32.gmra.mxu3 %v81_v13 }
  0x4e   :  { %259 = vmatpush.msrb.mxu2 %v130_v9  ;;  %218 = vmatpush.msrb.mxu1 %v114_v10 }
  0x4f   :  { %260 = vmatmul.f32.vlgmr.msrb.gmra.mxu2 %v68_v11  ;;  %219 = vmatmul.f32.vlgmr.msrb.gmra.mxu1 %v67_v12 }
  0x55   :  { %313 = vmatmul.f32.gmra.mxu3 %v85_v16 }
  0x57   :  { %263 = vmatmul.f32.gmra.mxu2 %v72_v14  ;;  %222 = vmatmul.f32.gmra.mxu1 %v71_v15 }
  0x5d   :  { %316 = vmatmul.f32.gmra.mxu3 %v89_v19 }
  0x5f   :  { %266 = vmatmul.f32.gmra.mxu2 %v76_v17  ;;  %225 = vmatmul.f32.gmra.mxu1 %v75_v18 }
  0x65   :  { %319 = vmatmul.f32.gmra.mxu3 %v93_v22 }
  0x67   :  { %269 = vmatmul.f32.gmra.mxu2 %v80_v20  ;;  %228 = vmatmul.f32.gmra.mxu1 %v79_v21 }
  0x6d   :  { %322 = vmatmul.f32.gmra.mxu3 %v97_v25  ;;  %v335_v25 = vld [vmem:[#allocation3 + $0x8] sm:$0xff] }
  0x6f   :  { %272 = vmatmul.f32.gmra.mxu2 %v84_v23  ;;  %231 = vmatmul.f32.gmra.mxu1 %v83_v24  ;;  %v334_v24 = vld [vmem:[#allocation3] sm:$0xff] }
  0x77   :  { %275 = vmatmul.f32.gmra.mxu2 %v88_v26  ;;  %234 = vmatmul.f32.gmra.mxu1 %v87_v27  ;;  %v336_v26 = vld [vmem:[#allocation3 + $0x10] sm:$0xff]  ;;  %v337_v27 = vld [vmem:[#allocation3 + $0x18] sm:$0xff] }
  0x7f   :  { %278 = vmatmul.f32.gmra.mxu2 %v92_v28  ;;  %237 = vmatmul.f32.gmra.mxu1 %v91_v29  ;;  %v338_v28 = vld [vmem:[#allocation3 + $0x20] sm:$0xff]  ;;  %v339_v29 = vld [vmem:[#allocation3 + $0x28] sm:$0xff] }
  0x87   :  { %281 = vmatmul.f32.gmra.mxu2 %v96_v30  ;;  %240 = vmatmul.f32.gmra.mxu1 %v95_v31  ;;  %v340_v30 = vld [vmem:[#allocation3 + $0x30] sm:$0xff]  ;;  %v341_v31 = vld [vmem:[#allocation3 + $0x38] sm:$0xff] }
  0xac   :  { %v185_v32 = vpop.f32.mrf.mxu1 }
  0xb0   :  { %v179_v39 = vpop.f32.mrf.mxu0 }
  0xb2   :  { %v197_v35 = vpop.f32.mrf.mxu2 }
  0xb4   :  { %v188_v33 = vpop.f32.mrf.mxu1 }
  0xb8   :  { %v302_v36 = vpop.f32.mrf.mxu3  ;;  %v182_v10 = vpop.f32.mrf.mxu0 }
  0xba   :  { %v200_v38 = vpop.f32.mrf.mxu2 }
  0xbc   :  { %v191_v34 = vpop.f32.mrf.mxu1 }
  0xc0   :  { %v305_v41 = vpop.f32.mrf.mxu3 }
  0xc4   :  { %v194_v37 = vpop.f32.mrf.mxu1 }
  0xc8   :  { %v308_v47 = vpop.f32.mrf.mxu3 }
  0xcc   :  { %v220_v40 = vpop.f32.mrf.mxu1 }
  0xcd   :  { %v221_v42 = vadd.f32 %v220_v40, %v179_v39 }
  0xd0   :  { %v311_v51 = vpop.f32.mrf.mxu3 }
  0xd2   :  { %v261_v43 = vpop.f32.mrf.mxu2 }
  0xd3   :  { %v262_v44 = vadd.f32 %v261_v43, %v221_v42 }
  0xd4   :  { %v223_v46 = vpop.f32.mrf.mxu1 }
  0xd5   :  { %v303_v45 = vadd.f32 %v302_v36, %v262_v44  ;;  %v224_v14 = vadd.f32 %v223_v46, %v182_v10 }
  0xd8   :  { %v314_v54 = vpop.f32.mrf.mxu3 }
  0xda   :  { %v264_v48 = vpop.f32.mrf.mxu2 }
  0xdb   :  { %v265_v20 = vadd.f32 %v264_v48, %v224_v14 }
  0xdc   :  { %v226_v49 = vpop.f32.mrf.mxu1 }
  0xdd   :  { %v227_v15 = vadd.f32 %v226_v49, %v185_v32  ;;  %v306_v23 = vadd.f32 %v305_v41, %v265_v20 }
  0xe0   :  { %v317_v58 = vpop.f32.mrf.mxu3 }
  0xe2   :  { %v267_v50 = vpop.f32.mrf.mxu2 }
  0xe3   :  { %v268_v18 = vadd.f32 %v267_v50, %v227_v15 }
  0xe4   :  { %v229_v52 = vpop.f32.mrf.mxu1 }
  0xe5   :  { %v230_v11 = vadd.f32 %v229_v52, %v188_v33  ;;  %v309_v22 = vadd.f32 %v308_v47, %v268_v18 }
  0xe8   :  { %v320_v61 = vpop.f32.mrf.mxu3 }
  0xea   :  { %v270_v53 = vpop.f32.mrf.mxu2 }
  0xeb   :  { %v271_v16 = vadd.f32 %v270_v53, %v230_v11 }
  0xec   :  { %v232_v55 = vpop.f32.mrf.mxu1 }
  0xed   :  { %v233_v7 = vadd.f32 %v232_v55, %v191_v34  ;;  %v312_v21 = vadd.f32 %v311_v51, %v271_v16 }
  0xf0   :  { %v323_v3 = vpop.f32.mrf.mxu3 }
  0xf2   :  { %v273_v56 = vpop.f32.mrf.mxu2 }
  0xf3   :  { %v274_v12 = vadd.f32 %v273_v56, %v233_v7 }
  0xf4   :  { %v235_v57 = vpop.f32.mrf.mxu1 }
  0xf5   :  { %v236_v4 = vadd.f32 %v235_v57, %v194_v37  ;;  %v315_v19 = vadd.f32 %v314_v54, %v274_v12 }
  0xfa   :  { %v276_v59 = vpop.f32.mrf.mxu2 }
  0xfb   :  { %v277_v8 = vadd.f32 %v276_v59, %v236_v4 }
  0xfc   :  { %v238_v60 = vpop.f32.mrf.mxu1 }
  0xfd   :  { %v239_v0 = vadd.f32 %v238_v60, %v197_v35  ;;  %v318_v17 = vadd.f32 %v317_v58, %v277_v8 }
 0x102   :  { %v279_v62 = vpop.f32.mrf.mxu2 }
 0x103   :  { %v280_v5 = vadd.f32 %v279_v62, %v239_v0 }
 0x104   :  { %v241_v63 = vpop.f32.mrf.mxu1 }
 0x105   :  { %v242_v1 = vadd.f32 %v241_v63, %v200_v38  ;;  %v321_v13 = vadd.f32 %v320_v61, %v280_v5 }
 0x10a   :  { %v282_v2 = vpop.f32.mrf.mxu2 }
 0x10b   :  { %v283_v6 = vadd.f32 %v282_v2, %v242_v1 }
 0x10d   :  { %v324_v9 = vadd.f32 %v323_v3, %v283_v6 }
 0x10f   :  { %383 = vmatpush.msrb.mxu0 %v324_v9 }
 0x111   :  { %384 = vmatpush.msrb.mxu0 %v321_v13 }
 0x113   :  { %385 = vmatpush.msrb.mxu0 %v318_v17 }
 0x115   :  { %386 = vmatpush.msrb.mxu0 %v315_v19 }
 0x117   :  { %387 = vmatpush.msrb.mxu0 %v312_v21 }
 0x119   :  { %388 = vmatpush.msrb.mxu0 %v309_v22 }
 0x11b   :  { %389 = vmatpush.msrb.mxu0 %v306_v23 }
 0x11d   :  { %390 = vmatpush.msrb.mxu0 %v303_v45 }
 0x11e   :  { %452 = vmatmul.msk.f32.vlgmr.msrb.gmra.mxu0 %vm350_vm0, %v334_v24 }
 0x126   :  { %453 = vmatmul.msk.f32.gmra.mxu0 %vm350_vm0, %v335_v25 }
 0x12e   :  { %454 = vmatmul.msk.f32.gmra.mxu0 %vm350_vm0, %v336_v26 }
 0x136   :  { %455 = vmatmul.msk.f32.gmra.mxu0 %vm350_vm0, %v337_v27 }
 0x13e   :  { %456 = vmatmul.msk.f32.gmra.mxu0 %vm350_vm0, %v338_v28 }
 0x146   :  { %457 = vmatmul.msk.f32.gmra.mxu0 %vm350_vm0, %v339_v29 }
 0x14e   :  { %458 = vmatmul.msk.f32.gmra.mxu0 %vm350_vm0, %v340_v30 }
 0x156   :  { %459 = vmatmul.msk.f32.gmra.mxu0 %vm350_vm0, %v341_v31 }
 0x19b   :  { %v392_v32 = vpop.f32.mrf.mxu0 }
 0x19c   :  { %v416_v33 = vmax.f32 %v392_v32, 0.0 }
 0x19e   :  { %424 = vst [vmem:[#allocation9] sm:$0xff] %v416_v33 }
 0x1a3   :  { %v395_v34 = vpop.f32.mrf.mxu0 }
 0x1a4   :  { %v417_v35 = vmax.f32 %v395_v34, 0.0 }
 0x1a6   :  { %425 = vst [vmem:[#allocation9 + $0x8] sm:$0xff] %v417_v35 }
 0x1ab   :  { %v398_v36 = vpop.f32.mrf.mxu0 }
 0x1ac   :  { %v418_v37 = vmax.f32 %v398_v36, 0.0 }
 0x1ae   :  { %426 = vst [vmem:[#allocation9 + $0x10] sm:$0xff] %v418_v37 }
 0x1b3   :  { %v401_v38 = vpop.f32.mrf.mxu0 }
 0x1b4   :  { %v419_v39 = vmax.f32 %v401_v38, 0.0 }
 0x1b6   :  { %427 = vst [vmem:[#allocation9 + $0x18] sm:$0xff] %v419_v39 }
 0x1bb   :  { %v404_v40 = vpop.f32.mrf.mxu0 }
 0x1bc   :  { %v420_v41 = vmax.f32 %v404_v40, 0.0 }
 0x1be   :  { %428 = vst [vmem:[#allocation9 + $0x20] sm:$0xff] %v420_v41 }
 0x1c3   :  { %v407_v42 = vpop.f32.mrf.mxu0 }
 0x1c4   :  { %v421_v43 = vmax.f32 %v407_v42, 0.0 }
 0x1c6   :  { %429 = vst [vmem:[#allocation9 + $0x28] sm:$0xff] %v421_v43 }
 0x1cb   :  { %v410_v44 = vpop.f32.mrf.mxu0 }
 0x1cc   :  { %v422_v45 = vmax.f32 %v410_v44, 0.0 }
 0x1ce   :  { %430 = vst [vmem:[#allocation9 + $0x30] sm:$0xff] %v422_v45 }
 0x1d3   :  { %v413_v46 = vpop.f32.mrf.mxu0 }
 0x1d4   :  { %v423_v47 = vmax.f32 %v413_v46, 0.0 }
 0x1d6   :  { %431 = vst [vmem:[#allocation9 + $0x38] sm:$0xff] %v423_v47 }
 0x1d7   :  { %444 = dma.vmem_to_hbm [thread:$0]  %s437_s29, 1024, %s439_s5, [#allocation5], %s606_s24, %s606_s24, %s607_s25  }
 0x1d8   :  { %600 = dma.done.wait [#allocation5], 1024  }
 0x1d9   :  { %601 = vsyncadd [#allocation5], 4294966272 }
 0x1da   :  { %449 = vsyncpa [#allocation4], 1 }
 0x1db   :  { %450 = vsyncpa [#allocation7], 1 }
 0x1dc   :  { %451 = vsyncpa [#allocation5], 1 }

</bundles_post_ra>
